<compile_context>
chip_gen: v7x
topology: tpu7x:2x2x1
jax: 0.10.0
libtpu: 0.0.40
codegen_flags: <defaults>
</compile_context>

<pallas_src>
import functools

import jax
import jax.numpy as jnp
from jax.experimental import pallas as pl
from jax.experimental.pallas import tpu as pltpu

_LANE = 128
_SUB = 8

# Above this batch size, a would-be 1-step grid is split in two so v7x's two
# TensorCores both run ("parallel" grid axis); below it the extra step is
# pure overhead on 1-TC chips.
_MIN_SPLIT_BATCH = 256
# At/above this batch size the narrow (unpadded action_dim) output is used:
# 32x less HBM writeback dominates the masked-store penalty.
_NARROW_OUT_BATCH = 512


def _round_up(n, m):
    return (n + m - 1) // m * m


def _actor_kernel(x_ref, w1_ref, b1_ref, w2_ref, b2_ref, w3_ref, b3_ref,
                  out_ref):
    x = x_ref[...]
    dot_dtype = x.dtype  # == weight dtype (f32 or bf16); biases stay f32

    # layer 1: relu(x @ W1 + b1)   (MXU dot, f32 accumulation, f32 relu)
    h = (jnp.dot(x, w1_ref[...], preferred_element_type=jnp.float32)
         + b1_ref[...])
    h = jnp.maximum(h, 0.0).astype(dot_dtype)

    # layer 2: relu(h @ W2 + b2)
    h = (jnp.dot(h, w2_ref[...], preferred_element_type=jnp.float32)
         + b2_ref[...])
    h = jnp.maximum(h, 0.0).astype(dot_dtype)

    # layer 3: tanh(h @ W3 + b3) * 2   (tanh -> EUP, mul -> VPU, all f32)
    o = (jnp.dot(h, w3_ref[...], preferred_element_type=jnp.float32)
         + b3_ref[...])
    out_ref[...] = (jnp.tanh(o) * 2.0).astype(out_ref.dtype)


def prepare_actor_params(params, dtype=jnp.float32):
    """One-time layout prep (hoisted out of the per-call forward path).

    Returns padded weights (in `dtype`), f32 biases, and both the narrow and
    lane-dense variants of the output layer.
    """
    w1, b1, w2, b2, w3, b3 = params
    S, H = w1.shape
    A = w3.shape[1]
    Sp = _round_up(S, _SUB)
    Hp = _round_up(H, _LANE)
    Ap = _round_up(A, _LANE)

    w1p = jnp.pad(w1, ((0, Sp - S), (0, Hp - H))).astype(dtype)
    b1p = jnp.pad(b1.reshape(1, H), ((0, 0), (0, Hp - H))).astype(jnp.float32)
    w2p = jnp.pad(w2, ((0, Hp - H), (0, Hp - H))).astype(dtype)
    b2p = jnp.pad(b2.reshape(1, H), ((0, 0), (0, Hp - H))).astype(jnp.float32)
    # narrow-output variant (last dim = true action_dim) -> large batches
    w3n = jnp.pad(w3, ((0, Hp - H), (0, 0))).astype(dtype)
    b3n = b3.reshape(1, A).astype(jnp.float32)
    # lane-dense variant (action dim padded to 128 lanes) -> small batches
    w3p = jnp.pad(w3, ((0, Hp - H), (0, Ap - A))).astype(dtype)
    b3p = jnp.pad(b3.reshape(1, A), ((0, 0), (0, Ap - A))).astype(jnp.float32)
    return (w1p, b1p, w2p, b2p, w3n, b3n, w3p, b3p)


@functools.partial(jax.jit, static_argnames=("batch_tile",))
def actor_forward(x, prepared, *, batch_tile=1024):
    """x: [B, state_dim] -> action: [B, action_dim]."""
    w1p, b1p, w2p, b2p, w3n, b3n, w3p, b3p = prepared
    B, S = x.shape
    Sp, Hp = w1p.shape
    A = w3n.shape[1]
    Ap = w3p.shape[1]

    x = x.astype(w1p.dtype)
    if S != Sp:  # pad state_dim to a sublane multiple (exact; zero columns)
        x = jnp.pad(x, ((0, 0), (0, Sp - S)))

    # Batch tile: large (amortizes per-step pipeline overhead), multiple of 8,
    # clamped to the batch and to a VMEM-safe maximum of 2048.
    TB = max(_SUB, min(min(batch_tile, 2048), _round_up(B, _SUB)))
    if B >= _MIN_SPLIT_BATCH and _round_up(B, _SUB) <= TB:
        # Would be a 1-step grid: split so v7x's two TensorCores both run.
        TB = _round_up(pl.cdiv(_round_up(B, _SUB), 2), _SUB)
    Bp = _round_up(B, TB)
    if Bp != B:
        x = jnp.pad(x, ((0, Bp - B), (0, 0)))

    # Output layout: lane-dense padded (Ap) for small batches, narrow (A) for
    # large batches where HBM writeback bytes dominate.
    narrow = B >= _NARROW_OUT_BATCH
    w3, b3, Aout = (w3n, b3n, A) if narrow else (w3p, b3p, Ap)

    grid = (Bp // TB,)
    full = lambda r, c: pl.BlockSpec((r, c), lambda i: (0, 0))

    out = pl.pallas_call(
        _actor_kernel,
        out_shape=jax.ShapeDtypeStruct((Bp, Aout), jnp.float32),
        grid_spec=pltpu.PrefetchScalarGridSpec(
            num_scalar_prefetch=0,
            grid=grid,
            in_specs=[
                pl.BlockSpec((TB, Sp), lambda i: (i, 0)),   # x tile
                full(Sp, Hp),                               # W1 (constant idx)
                full(1, Hp),                                # b1
                full(Hp, Hp),                               # W2
                full(1, Hp),                                # b2
                full(Hp, Aout),                             # W3
                full(1, Aout),                              # b3
            ],
            out_specs=pl.BlockSpec((TB, Aout), lambda i: (i, 0)),
        ),
        compiler_params=pltpu.CompilerParams(
            dimension_semantics=("parallel",)),
    )(x, w1p, b1p, w2p, b2p, w3, b3)

    return out[:B, :A]


def init_actor_params(key, state_dim, action_dim, hidden_dim=64):
    """PyTorch-style (uniform +-1/sqrt(fan_in)) init; weights stored [in, out]."""
    ks = jax.random.split(key, 6)

    def u(k, shape, fan_in):
        lim = 1.0 / jnp.sqrt(jnp.float32(fan_in))
        return jax.random.uniform(k, shape, jnp.float32, -lim, lim)

    w1 = u(ks[0], (state_dim, hidden_dim), state_dim)
    b1 = u(ks[1], (hidden_dim,), state_dim)
    w2 = u(ks[2], (hidden_dim, hidden_dim), hidden_dim)
    b2 = u(ks[3], (hidden_dim,), hidden_dim)
    w3 = u(ks[4], (hidden_dim, action_dim), hidden_dim)
    b3 = u(ks[5], (action_dim,), hidden_dim)
    return (w1, b1, w2, b2, w3, b3)


def actor_ref(x, params):
    """Pure-JAX reference identical to the PyTorch forward."""
    w1, b1, w2, b2, w3, b3 = params
    h = jnp.maximum(x @ w1 + b1, 0.0)
    h = jnp.maximum(h @ w2 + b2, 0.0)
    return jnp.tanh(h @ w3 + b3) * 2.0


if __name__ == "__main__":
    key = jax.random.PRNGKey(0)
    k_xs, k_xl, k_p = jax.random.split(key, 3)

    state_dim, action_dim, hidden_dim = 8, 4, 64
    params = init_actor_params(k_p, state_dim, action_dim, hidden_dim)
    prepared = prepare_actor_params(params)                     # one-time prep

    # --- small ragged batch: single-step grid, lane-dense padded output ---
    x_small = jax.random.normal(k_xs, (20, state_dim), jnp.float32)
    y_small_ref = actor_ref(x_small, params)
    y_small = jax.block_until_ready(actor_forward(x_small, prepared))
    assert y_small.shape == (20, action_dim), y_small.shape
    assert jnp.allclose(y_small, y_small_ref, atol=1e-5, rtol=1e-5)

    # --- tiny tile: multi-step grid with a padded final batch block ---
    y_tiled = jax.block_until_ready(actor_forward(x_small, prepared, batch_tile=8))
    assert y_tiled.shape == (20, action_dim), y_tiled.shape
    assert jnp.allclose(y_tiled, y_small_ref, atol=1e-5, rtol=1e-5)

    # --- larger ragged batch: >=2 parallel grid steps (v7x 2-TC), narrow out ---
    x_large = jax.random.normal(k_xl, (1000, state_dim), jnp.float32)
    y_large_ref = actor_ref(x_large, params)
    y_large = jax.block_until_ready(actor_forward(x_large, prepared))
    assert y_large.shape == (1000, action_dim), y_large.shape
    assert jnp.allclose(y_large, y_large_ref, atol=1e-5, rtol=1e-5)

    # --- bf16 weights/activations (MXU-native), f32 accumulation + tanh ---
    prepared_bf16 = prepare_actor_params(params, dtype=jnp.bfloat16)
    y_bf16 = jax.block_until_ready(actor_forward(x_large, prepared_bf16))
    assert y_bf16.shape == (1000, action_dim), y_bf16.shape
    assert jnp.allclose(y_bf16, y_large_ref, atol=5e-2, rtol=5e-2)

    print("KERNEL_OK")
</pallas_src>

<mosaic_0001>
module attributes {stable_mosaic.version = 11 : i64} {
  func.func @_actor_kernel(%arg0: i32, %arg1: memref<24x8xf32, #tpu.memory_space<vmem>>, %arg2: memref<8x128xf32, #tpu.memory_space<vmem>>, %arg3: memref<1x128xf32, #tpu.memory_space<vmem>>, %arg4: memref<128x128xf32, #tpu.memory_space<vmem>>, %arg5: memref<1x128xf32, #tpu.memory_space<vmem>>, %arg6: memref<128x128xf32, #tpu.memory_space<vmem>>, %arg7: memref<1x128xf32, #tpu.memory_space<vmem>>, %arg8: memref<24x128xf32, #tpu.memory_space<vmem>>) attributes {dimension_semantics = [#tpu.dimension_semantics<parallel>], iteration_bounds = array<i64: 1>, scalar_prefetch = 0 : i64, scratch_operands = 0 : i64, tpu.core_type = #tpu.core_type<tc>, window_params = [{transform_indices = @transform_0, window_bounds = array<i64: 24, 8>}, {pipeline_mode = #tpu.pipeline_mode<synchronous>, transform_indices = @transform_1, window_bounds = array<i64: 8, 128>}, {pipeline_mode = #tpu.pipeline_mode<synchronous>, transform_indices = @transform_2, window_bounds = array<i64: 1, 128>}, {pipeline_mode = #tpu.pipeline_mode<synchronous>, transform_indices = @transform_3, window_bounds = array<i64: 128, 128>}, {pipeline_mode = #tpu.pipeline_mode<synchronous>, transform_indices = @transform_4, window_bounds = array<i64: 1, 128>}, {pipeline_mode = #tpu.pipeline_mode<synchronous>, transform_indices = @transform_5, window_bounds = array<i64: 128, 128>}, {pipeline_mode = #tpu.pipeline_mode<synchronous>, transform_indices = @transform_6, window_bounds = array<i64: 1, 128>}, {transform_indices = @transform_7, window_bounds = array<i64: 24, 128>}]} {
    %c0 = arith.constant 0 : index
    %c0_0 = arith.constant 0 : index
    %0 = vector.load %arg1[%c0, %c0_0] : memref<24x8xf32, #tpu.memory_space<vmem>>, vector<24x8xf32>
    %c0_1 = arith.constant 0 : index
    %c0_2 = arith.constant 0 : index
    %1 = vector.load %arg2[%c0_1, %c0_2] : memref<8x128xf32, #tpu.memory_space<vmem>>, vector<8x128xf32>
    %cst = arith.constant dense<0.000000e+00> : vector<24x128xf32>
    %2 = tpu.matmul %0, %1, %cst {dimension_numbers = #tpu.dot_dimension_numbers<[1], [0], [0], [1], [0, 0, 1, 1], [], []>} : vector<24x8xf32>, vector<8x128xf32>, vector<24x128xf32> -> vector<24x128xf32>
    %c0_3 = arith.constant 0 : index
    %c0_4 = arith.constant 0 : index
    %3 = vector.load %arg3[%c0_3, %c0_4] : memref<1x128xf32, #tpu.memory_space<vmem>>, vector<1x128xf32>
    %4 = vector.broadcast %3 : vector<1x128xf32> to vector<24x128xf32>
    %5 = arith.addf %2, %4 : vector<24x128xf32>
    %cst_5 = arith.constant 0.000000e+00 : f32
    %6 = vector.broadcast %cst_5 : f32 to vector<24x128xf32>
    %7 = arith.maximumf %5, %6 : vector<24x128xf32>
    %c0_6 = arith.constant 0 : index
    %c0_7 = arith.constant 0 : index
    %8 = vector.load %arg4[%c0_6, %c0_7] : memref<128x128xf32, #tpu.memory_space<vmem>>, vector<128x128xf32>
    %cst_8 = arith.constant dense<0.000000e+00> : vector<24x128xf32>
    %9 = tpu.matmul %7, %8, %cst_8 {dimension_numbers = #tpu.dot_dimension_numbers<[1], [0], [0], [1], [0, 0, 1, 1], [], []>} : vector<24x128xf32>, vector<128x128xf32>, vector<24x128xf32> -> vector<24x128xf32>
    %c0_9 = arith.constant 0 : index
    %c0_10 = arith.constant 0 : index
    %10 = vector.load %arg5[%c0_9, %c0_10] : memref<1x128xf32, #tpu.memory_space<vmem>>, vector<1x128xf32>
    %11 = vector.broadcast %10 : vector<1x128xf32> to vector<24x128xf32>
    %12 = arith.addf %9, %11 : vector<24x128xf32>
    %cst_11 = arith.constant 0.000000e+00 : f32
    %13 = vector.broadcast %cst_11 : f32 to vector<24x128xf32>
    %14 = arith.maximumf %12, %13 : vector<24x128xf32>
    %c0_12 = arith.constant 0 : index
    %c0_13 = arith.constant 0 : index
    %15 = vector.load %arg6[%c0_12, %c0_13] : memref<128x128xf32, #tpu.memory_space<vmem>>, vector<128x128xf32>
    %cst_14 = arith.constant dense<0.000000e+00> : vector<24x128xf32>
    %16 = tpu.matmul %14, %15, %cst_14 {dimension_numbers = #tpu.dot_dimension_numbers<[1], [0], [0], [1], [0, 0, 1, 1], [], []>} : vector<24x128xf32>, vector<128x128xf32>, vector<24x128xf32> -> vector<24x128xf32>
    %c0_15 = arith.constant 0 : index
    %c0_16 = arith.constant 0 : index
    %17 = vector.load %arg7[%c0_15, %c0_16] : memref<1x128xf32, #tpu.memory_space<vmem>>, vector<1x128xf32>
    %18 = vector.broadcast %17 : vector<1x128xf32> to vector<24x128xf32>
    %19 = arith.addf %16, %18 : vector<24x128xf32>
    %20 = math.tanh %19 : vector<24x128xf32>
    %cst_17 = arith.constant 2.000000e+00 : f32
    %21 = vector.broadcast %cst_17 : f32 to vector<24x128xf32>
    %22 = arith.mulf %20, %21 : vector<24x128xf32>
    %c0_18 = arith.constant 0 : index
    %c0_19 = arith.constant 0 : index
    %23 = vector.load %arg8[%c0_18, %c0_19] : memref<24x128xf32, #tpu.memory_space<vmem>>, vector<24x128xf32>
    tpu.vector_store %arg8[%c0_18, %c0_19], %22 {strides = array<i32>} : memref<24x128xf32, #tpu.memory_space<vmem>>, vector<24x128xf32>,
    return
  }
  func.func @transform_0(%arg0: i32) -> (i32, i32) {
    %c0_i32 = arith.constant 0 : i32
    %c0_i32_0 = arith.constant 0 : i32
    return %arg0, %c0_i32 : i32, i32
  }
  func.func @transform_1(%arg0: i32) -> (i32, i32) {
    %c0_i32 = arith.constant 0 : i32
    %c0_i32_0 = arith.constant 0 : i32
    %c0_i32_1 = arith.constant 0 : i32
    return %c0_i32, %c0_i32_0 : i32, i32
  }
  func.func @transform_2(%arg0: i32) -> (i32, i32) {
    %c0_i32 = arith.constant 0 : i32
    %c0_i32_0 = arith.constant 0 : i32
    %c0_i32_1 = arith.constant 0 : i32
    return %c0_i32, %c0_i32_0 : i32, i32
  }
  func.func @transform_3(%arg0: i32) -> (i32, i32) {
    %c0_i32 = arith.constant 0 : i32
    %c0_i32_0 = arith.constant 0 : i32
    %c0_i32_1 = arith.constant 0 : i32
    return %c0_i32, %c0_i32_0 : i32, i32
  }
  func.func @transform_4(%arg0: i32) -> (i32, i32) {
    %c0_i32 = arith.constant 0 : i32
    %c0_i32_0 = arith.constant 0 : i32
    %c0_i32_1 = arith.constant 0 : i32
    return %c0_i32, %c0_i32_0 : i32, i32
  }
  func.func @transform_5(%arg0: i32) -> (i32, i32) {
    %c0_i32 = arith.constant 0 : i32
    %c0_i32_0 = arith.constant 0 : i32
    %c0_i32_1 = arith.constant 0 : i32
    return %c0_i32, %c0_i32_0 : i32, i32
  }
  func.func @transform_6(%arg0: i32) -> (i32, i32) {
    %c0_i32 = arith.constant 0 : i32
    %c0_i32_0 = arith.constant 0 : i32
    %c0_i32_1 = arith.constant 0 : i32
    return %c0_i32, %c0_i32_0 : i32, i32
  }
  func.func @transform_7(%arg0: i32) -> (i32, i32) {
    %c0_i32 = arith.constant 0 : i32
    %c0_i32_0 = arith.constant 0 : i32
    return %arg0, %c0_i32 : i32, i32
  }
}

</mosaic_0001>

<bundles_post_ra>
// kernel: actor_forward.1
= control target key start
LH: loop header
LB: loop body
LE: loop exit
PB: predicated region body
PF: predicated region fallthrough
CT: control target
= control target key end

     0   :  { %12 = vsyncpa [#allocation3], 0  ;;  %s771_s0 = inlined_call_operand.vmem [shape: f32[24,8], index: 0, kind: input, shape index: {}]   ;;  %s772_s1 = inlined_call_operand.vmem [shape: f32[8,128], index: 1, kind: input, shape index: {}]   ;;  %s773_s2 = inlined_call_operand.vmem [shape: f32[1,128], index: 2, kind: input, shape index: {}]   ;;  %s774_s3 = inlined_call_operand.hbm [shape: f32[128,128], index: 3, kind: input, shape index: {}]   ;;  %s775_s4 = inlined_call_operand.vmem [shape: f32[1,128], index: 4, kind: input, shape index: {}]   ;;  %s776_s5 = inlined_call_operand.hbm [shape: f32[128,128], index: 5, kind: input, shape index: {}]   ;;  %s777_s6 = inlined_call_operand.vmem [shape: f32[1,128], index: 6, kind: input, shape index: {}]   ;;  %s778_s7 = inlined_call_operand.vmem [shape: f32[24,128], index: 7, kind: output, shape index: {}]  }
   0x1   :  { %13 = vsyncpa [#allocation5], 0  ;;  %s632_s24 = smov [#allocation2]   ;;  %s584_s28 = scalar_lea.hbm %s774_s3, 2048 }
   0x2   :  { %s25_s25 = sshll.u32 %s632_s24, 4  ;;  %p585_p0 = scmp.ne.s32.totalorder %s774_s3, %s584_s28  ;;  %s26_s25 = int_to_ptr.vmem [resolvable:$true] %s25_s25 }
   0x3   :  { %p588_p1 = scmp.lt.u32.totalorder %s584_s28, %s774_s3 }
   0x5   :  { %p590_p2 = pnand %p588_p1, %p585_p0 }
   0x7   :  { %593 = shalt.err (!%p590_p2)
}
   0x8   :  { %s594_s10 = scalar_lea.vmem %s26_s25, 2048  ;;  %p599_p4 = scmp.lt.s32.totalorder %s26_s25, %s26_s25 }
   0x9   :  { %p595_p3 = scmp.ne.s32.totalorder %s26_s25, %s594_s10  ;;  %p600_p5 = scmp.lt.s32.totalorder %s594_s10, %s594_s10 }
   0xb   :  { %p601_p6 = por %p600_p5, %p599_p4 }
   0xd   :  { %p602_p7 = pnand %p601_p6, %p595_p3 }
   0xf   :  { %605 = shalt.err (!%p602_p7)
}
  0x10   :  { %s633_s11 = smov 128   ;;  %s634_s12 = smov 8  }
  0x11   :  { %31 = dma.hbm_to_vmem [thread:$0]  %s774_s3, 2048, %s26_s25, [#allocation3], %s633_s11, %s633_s11, %s634_s12  }
  0x12   :  { %s635_s15 = smov [#allocation4]   ;;  %s606_s19 = scalar_lea.hbm %s776_s5, 2048 }
  0x13   :  { %s39_s16 = sshll.u32 %s635_s15, 4  ;;  %p607_p8 = scmp.ne.s32.totalorder %s776_s5, %s606_s19  ;;  %s40_s16 = int_to_ptr.vmem [resolvable:$true] %s39_s16 }
  0x14   :  { %p610_p9 = scmp.lt.u32.totalorder %s606_s19, %s776_s5 }
  0x16   :  { %p612_p10 = pnand %p610_p9, %p607_p8 }
  0x18   :  { %615 = shalt.err (!%p612_p10)
}
  0x19   :  { %s616_s24 = scalar_lea.vmem %s40_s16, 2048  ;;  %p621_p12 = scmp.lt.s32.totalorder %s40_s16, %s40_s16 }
  0x1a   :  { %p617_p11 = scmp.ne.s32.totalorder %s40_s16, %s616_s24  ;;  %p622_p13 = scmp.lt.s32.totalorder %s616_s24, %s616_s24 }
  0x1c   :  { %p623_p0 = por %p622_p13, %p621_p12 }
  0x1e   :  { %p624_p1 = pnand %p623_p0, %p617_p11 }
  0x20   :  { %627 = shalt.err (!%p624_p1)
}
  0x21   :  { %45 = dma.hbm_to_vmem [thread:$0]  %s776_s5, 2048, %s40_s16, [#allocation5], %s633_s11, %s633_s11, %s634_s12  }
  0x22   :  { %628 = dma.done.wait [#allocation3], 2048  }
  0x23   :  { %629 = vsyncadd [#allocation3], 4294965248 }
  0x24   :  { %630 = dma.done.wait [#allocation5], 2048  }
  0x25   :  { %631 = vsyncadd [#allocation5], 4294965248  ;;  %v636_v0 = vmov 0.0   ;;  %vm637_vm0 = vmmov 0   ;;  %v638_v1 = vmov 0.0|0.0   ;;  %vm65_vm1 = vcmask 64512  }
  0x26   :  { %430 = vmatprep.subr.mxu0 %v636_v0  ;;  %432 = vmatprep.mubr.msk.f32.mxu0 %vm637_vm0, %v636_v0  ;;  %v57_v2 = vld [vmem:[%s772_s1] sm:$0xff]  ;;  %v159_v5 = vld [vmem:[#allocation2 + $0x8] sm:$0xff]  ;;  %v160_v7 = vld [vmem:[#allocation2 + $0x10] sm:$0xff] }
  0x27   :  { %523 = vmatprep.subr.bf16.mxu1 %v638_v1  ;;  %473 = vmatprep.mubr.msk.f32.mxu1 %vm637_vm0, %v636_v0  ;;  %v54_v3 = vld [vmem:[%s771_s0] sm:$0xff]  ;;  %v161_v8 = vld [vmem:[#allocation2 + $0x18] sm:$0xff]  ;;  %v55_v9 = vld [vmem:[%s771_s0 + $0x8] sm:$0xff] }
  0x28   :  { %431 = vmatpush3.msra.mxu0 %v57_v2  ;;  %v158_v4 = vld [vmem:[#allocation2] sm:$0xff]  ;;  %v527_v10 = vpack.c.bf16 %v161_v8, %v160_v7  ;;  %v163_v12 = vld [vmem:[#allocation2 + $0x28] sm:$0xff]  ;;  %v56_v13 = vld [vmem:[%s771_s0 + $0x10] sm:$0xff] }
  0x29   :  { %433 = vmatmul.mubr.msk.f32.vlgmr.msra.gmra.mrb[0].mxu0 %vm65_vm1, %v54_v3  ;;  %v524_v6 = vpack.c.bf16 %v159_v5, %v158_v4  ;;  %547 = vmatprep.subr.bf16.mxu0 %v638_v1  ;;  %v162_v11 = vld [vmem:[#allocation2 + $0x20] sm:$0xff]  ;;  %v164_v15 = vld [vmem:[#allocation2 + $0x30] sm:$0xff]  ;;  %v165_v16 = vld [vmem:[#allocation2 + $0x38] sm:$0xff] }
  0x2a   :  { %435 = vmatprep.mubr.msk.f32.mxu0 %vm637_vm0, %v636_v0  ;;  %v530_v14 = vpack.c.bf16 %v163_v12, %v162_v11  ;;  %v533_v17 = vpack.c.bf16 %v165_v16, %v164_v15  ;;  %v166_v18 = vld [vmem:[#allocation2 + $0x40] sm:$0xff]  ;;  %v167_v19 = vld [vmem:[#allocation2 + $0x48] sm:$0xff]  ;;  %v168_v21 = vld [vmem:[#allocation2 + $0x50] sm:$0xff] }
  0x2b   :  { %525 = vmatpush3.bf16.msra.mxu1 %v524_v6  ;;  %v536_v20 = vpack.c.bf16 %v167_v19, %v166_v18  ;;  %v169_v22 = vld [vmem:[#allocation2 + $0x58] sm:$0xff]  ;;  %v170_v24 = vld [vmem:[#allocation2 + $0x60] sm:$0xff]  ;;  %v171_v25 = vld [vmem:[#allocation2 + $0x68] sm:$0xff] }
  0x2c   :  { %526 = vmatprep.subr.bf16.mxu1 %v638_v1  ;;  %v539_v23 = vpack.c.bf16 %v169_v22, %v168_v21  ;;  %v542_v26 = vpack.c.bf16 %v171_v25, %v170_v24  ;;  %v172_v27 = vld [vmem:[#allocation2 + $0x70] sm:$0xff]  ;;  %v173_v28 = vld [vmem:[#allocation2 + $0x78] sm:$0xff]  ;;  %v264_v30 = vld [vmem:[#allocation4] sm:$0xff] }
  0x2d   :  { %436 = vmatmul.mubr.msk.f32.gmra.mrb[2].mxu0 %vm65_vm1, %v55_v9  ;;  %v545_v29 = vpack.c.bf16 %v173_v28, %v172_v27  ;;  %v265_v31 = vld [vmem:[#allocation4 + $0x8] sm:$0xff]  ;;  %v266_v32 = vld [vmem:[#allocation4 + $0x10] sm:$0xff]  ;;  %v267_v34 = vld [vmem:[#allocation4 + $0x18] sm:$0xff] }
  0x2e   :  { %438 = vmatprep.mubr.msk.f32.mxu0 %vm637_vm0, %v636_v0  ;;  %v548_v33 = vpack.c.bf16 %v265_v31, %v264_v30  ;;  %v551_v35 = vpack.c.bf16 %v267_v34, %v266_v32  ;;  %v268_v36 = vld [vmem:[#allocation4 + $0x20] sm:$0xff]  ;;  %v269_v37 = vld [vmem:[#allocation4 + $0x28] sm:$0xff]  ;;  %v270_v39 = vld [vmem:[#allocation4 + $0x30] sm:$0xff] }
  0x2f   :  { %528 = vmatpush3.bf16.msra.mxu1 %v527_v10  ;;  %v554_v38 = vpack.c.bf16 %v269_v37, %v268_v36  ;;  %v271_v40 = vld [vmem:[#allocation4 + $0x38] sm:$0xff]  ;;  %v272_v42 = vld [vmem:[#allocation4 + $0x40] sm:$0xff]  ;;  %v273_v43 = vld [vmem:[#allocation4 + $0x48] sm:$0xff] }
  0x30   :  { %529 = vmatprep.subr.bf16.mxu1 %v638_v1  ;;  %549 = vmatpush3.bf16.msra.mxu0 %v548_v33  ;;  %v557_v41 = vpack.c.bf16 %v271_v40, %v270_v39  ;;  %v560_v44 = vpack.c.bf16 %v273_v43, %v272_v42  ;;  %v274_v45 = vld [vmem:[#allocation4 + $0x50] sm:$0xff]  ;;  %v275_v46 = vld [vmem:[#allocation4 + $0x58] sm:$0xff]  ;;  %v276_v48 = vld [vmem:[#allocation4 + $0x60] sm:$0xff] }
  0x31   :  { %439 = vmatmul.mubr.msk.f32.gmra.mrb[4].mxu0 %vm65_vm1, %v56_v13  ;;  %550 = vmatprep.subr.bf16.mxu0 %v638_v1  ;;  %v563_v47 = vpack.c.bf16 %v275_v46, %v274_v45  ;;  %v277_v49 = vld [vmem:[#allocation4 + $0x68] sm:$0xff]  ;;  %v382_v51 = vld [vmem:[%s773_s2] ss:$0 sm:$0xff]  ;;  %v279_v2 = vld [vmem:[#allocation4 + $0x78] sm:$0xff] }
  0x32   :  { %514 = vmatprep.mubr.msk.f32.mxu0 %vm637_vm0, %v636_v0  ;;  %v566_v50 = vpack.c.bf16 %v277_v49, %v276_v48  ;;  %v386_v4 = vld [vmem:[%s775_s4] ss:$0 sm:$0xff] }
  0x33   :  { %531 = vmatpush3.bf16.msra.mxu1 %v530_v14 }
  0x34   :  { %532 = vmatprep.subr.bf16.mxu1 %v638_v1  ;;  %552 = vmatpush3.bf16.msra.mxu0 %v551_v35 }
  0x35   :  { %553 = vmatprep.subr.bf16.mxu0 %v638_v1 }
  0x37   :  { %534 = vmatpush3.bf16.msra.mxu1 %v533_v17  ;;  %v387_v17 = vld [vmem:[%s777_s6] ss:$0 sm:$0xff] }
  0x38   :  { %535 = vmatprep.subr.bf16.mxu1 %v638_v1  ;;  %555 = vmatpush3.bf16.msra.mxu0 %v554_v38 }
  0x39   :  { %556 = vmatprep.subr.bf16.mxu0 %v638_v1 }
  0x3b   :  { %537 = vmatpush3.bf16.msra.mxu1 %v536_v20 }
  0x3c   :  { %538 = vmatprep.subr.bf16.mxu1 %v638_v1  ;;  %558 = vmatpush3.bf16.msra.mxu0 %v557_v41 }
  0x3d   :  { %559 = vmatprep.subr.bf16.mxu0 %v638_v1 }
  0x3f   :  { %540 = vmatpush3.bf16.msra.mxu1 %v539_v23 }
  0x40   :  { %541 = vmatprep.subr.bf16.mxu1 %v638_v1  ;;  %561 = vmatpush3.bf16.msra.mxu0 %v560_v44 }
  0x41   :  { %562 = vmatprep.subr.bf16.mxu0 %v638_v1 }
  0x43   :  { %543 = vmatpush3.bf16.msra.mxu1 %v542_v26 }
  0x44   :  { %544 = vmatprep.subr.bf16.mxu1 %v638_v1  ;;  %564 = vmatpush3.bf16.msra.mxu0 %v563_v47 }
  0x45   :  { %565 = vmatprep.subr.bf16.mxu0 %v638_v1 }
  0x47   :  { %546 = vmatpush3.bf16.msra.mxu1 %v545_v29 }
  0x48   :  { %567 = vmatpush3.bf16.msra.mxu0 %v566_v50 }
  0x49   :  { %568 = vmatprep.subr.bf16.mxu0 %v638_v1  ;;  %v278_v1 = vld [vmem:[#allocation4 + $0x70] sm:$0xff] }
  0x4a   :  { %v569_v3 = vpack.c.bf16 %v279_v2, %v278_v1 }
  0x4c   :  { %570 = vmatpush3.bf16.msra.mxu0 %v569_v3 }
  0xfc   :  { %v141_v52 = vpop.f32.mrb[0].mxu0 }
  0xfd   :  { %v142_v53 = vadd.f32 %v382_v51, %v141_v52  ;;  %v434_v54 = vpop.f32.mrb[1].mxu0 }
  0xff   :  { %v155_v55 = vmax.f32 %v142_v53, 0.0 }
 0x100   :  { %v146_v56 = vpop.f32.mrb[2].mxu0 }
 0x101   :  { %v147_v57 = vadd.f32 %v382_v51, %v146_v56  ;;  %v437_v58 = vpop.f32.mrb[3].mxu0  ;;  %474 = vmatmul.mubr.f32.vlgmr.msra.gmra.mrb[0].mxu1 %v155_v55 }
 0x102   :  { %476 = vmatprep.mubr.msk.f32.mxu1 %vm637_vm0, %v636_v0 }
 0x103   :  { %v156_v59 = vmax.f32 %v147_v57, 0.0 }
 0x104   :  { %v151_v60 = vpop.f32.mrb[4].mxu0 }
 0x105   :  { %v152_v61 = vadd.f32 %v382_v51, %v151_v60  ;;  %v440_v62 = vpop.f32.mrb[5].mxu0  ;;  %477 = vmatmul.mubr.f32.gmra.mrb[2].mxu1 %v156_v59 }
 0x106   :  { %479 = vmatprep.mubr.msk.f32.mxu1 %vm637_vm0, %v636_v0 }
 0x107   :  { %v157_v63 = vmax.f32 %v152_v61, 0.0 }
 0x109   :  { %480 = vmatmul.mubr.f32.gmra.mrb[4].mxu1 %v157_v63 }
 0x1d4   :  { %v247_v5 = vpop.f32.mrb[0].mxu1 }
 0x1d5   :  { %v248_v6 = vadd.f32 %v386_v4, %v247_v5  ;;  %v475_v7 = vpop.f32.mrb[1].mxu1 }
 0x1d7   :  { %v261_v8 = vmax.f32 %v248_v6, 0.0 }
 0x1d8   :  { %v252_v9 = vpop.f32.mrb[2].mxu1 }
 0x1d9   :  { %v253_v10 = vadd.f32 %v386_v4, %v252_v9  ;;  %v478_v11 = vpop.f32.mrb[3].mxu1  ;;  %515 = vmatmul.mubr.f32.vlgmr.msra.gmra.mrb[6].mxu0 %v261_v8 }
 0x1da   :  { %517 = vmatprep.mubr.msk.f32.mxu0 %vm637_vm0, %v636_v0 }
 0x1db   :  { %v262_v12 = vmax.f32 %v253_v10, 0.0 }
 0x1dc   :  { %v257_v13 = vpop.f32.mrb[4].mxu1 }
 0x1dd   :  { %v258_v14 = vadd.f32 %v386_v4, %v257_v13  ;;  %v481_v15 = vpop.f32.mrb[5].mxu1  ;;  %518 = vmatmul.mubr.f32.gmra.mrb[8].mxu0 %v262_v12 }
 0x1de   :  { %520 = vmatprep.mubr.msk.f32.mxu0 %vm637_vm0, %v636_v0 }
 0x1df   :  { %v263_v16 = vmax.f32 %v258_v14, 0.0 }
 0x1e1   :  { %521 = vmatmul.mubr.f32.gmra.mrb[10].mxu0 %v263_v16 }
 0x2ac   :  { %v353_v18 = vpop.f32.mrb[6].mxu0 }
 0x2ad   :  { %v354_v19 = vadd.f32 %v387_v17, %v353_v18  ;;  %v516_v20 = vpop.f32.mrb[7].mxu0 }
 0x2af   :  { %578 = vtanh.f32 %v354_v19 }
 0x2b0   :  { %v358_v21 = vpop.f32.mrb[8].mxu0 }
 0x2b1   :  { %v359_v22 = vadd.f32 %v387_v17, %v358_v21  ;;  %v519_v23 = vpop.f32.mrb[9].mxu0 }
 0x2b3   :  { %580 = vtanh.f32 %v359_v22 }
 0x2b4   :  { %v363_v24 = vpop.f32.mrb[10].mxu0 }
 0x2b5   :  { %v364_v25 = vadd.f32 %v387_v17, %v363_v24  ;;  %v522_v26 = vpop.f32.mrb[11].mxu0 }
 0x2b7   :  { %582 = vtanh.f32 %v364_v25 }
 0x2b9   :  { %v579_v27 = vpop.eup %578 }
 0x2ba   :  { %v370_v0 = vmul.f32 2.0, %v579_v27 }
 0x2bc   :  { %373 = vst [vmem:[%s778_s7] sm:$0xff] %v370_v0 }
 0x2bd   :  { %v581_v28 = vpop.eup %580 }
 0x2be   :  { %v371_v29 = vmul.f32 2.0, %v581_v28 }
 0x2c0   :  { %374 = vst [vmem:[%s778_s7 + $0x8] sm:$0xff] %v371_v29 }
 0x2c1   :  { %v583_v30 = vpop.eup %582 }
 0x2c2   :  { %v372_v31 = vmul.f32 2.0, %v583_v30 }
 0x2c4   :  { %375 = vst [vmem:[%s778_s7 + $0x10] sm:$0xff] %v372_v31 }
 0x2c5   :  { %380 = vsyncpa [#allocation3], 1 }
 0x2c6   :  { %381 = vsyncpa [#allocation5], 1 }

</bundles_post_ra>
